<compile_context>
chip_gen: v7x
topology: tpu7x:2x2x1
jax: 0.10.0
libtpu: 0.0.40
codegen_flags: <defaults>
</compile_context>

<pallas_src>
import functools
import numpy as np
import jax
import jax.numpy as jnp
from jax.experimental import pallas as pl
from jax.experimental.pallas import tpu as pltpu

# Small, module-consistent shapes.
B, T, C = 2, 8, 32
N_HEAD = 4
HEAD = C // N_HEAD
HIDDEN = 4 * C
BT = B * T                    # 16 rows processed in one step
NBT = N_HEAD * BT             # 64 stacked-K/V rows (head-major, then batch, then t)
LN_EPS = 1e-5
INV_SQRT2 = float(1.0 / np.sqrt(2.0))


def _erf(x):
    # Abramowitz & Stegun 7.1.26 (|abs err| < 1.5e-7): exact-GELU within f32.
    a1, a2, a3, a4, a5 = 0.254829592, -0.284496736, 1.421413741, -1.453152027, 1.061405429
    p = 0.3275911
    s = jnp.where(x >= 0.0, 1.0, -1.0)
    z = jnp.abs(x)
    t = 1.0 / (1.0 + p * z)
    poly = ((((a5 * t + a4) * t + a3) * t + a2) * t + a1) * t
    return s * (1.0 - poly * jnp.exp(-z * z))


def _layernorm(x, g, b):
    mu = jnp.mean(x, axis=-1, keepdims=True)
    var = jnp.mean((x - mu) ** 2, axis=-1, keepdims=True)
    return (x - mu) * jax.lax.rsqrt(var + LN_EPS) * g + b


def gpt_block_kernel(x_ref, w_in_ref, w2_ref, vecs_ref, const_ref, o_ref):
    x = x_ref[...]                                # (BT, C) f32 — all batches at once

    vecs = vecs_ref[...]                          # (8, 128) f32 packed biases / LN params
    bqkv = vecs[0:1, 0:3 * C]
    bm1 = vecs[1:2, :]
    g1, be1 = vecs[2:3, 0:C], vecs[2:3, C:2 * C]
    g2, be2 = vecs[2:3, 2 * C:3 * C], vecs[2:3, 3 * C:4 * C]
    bp, bm2 = vecs[3:4, 0:C], vecs[3:4, C:2 * C]

    consts = const_ref[...]                       # (160, 64) f32 host-built constants
    head_mask = consts[0:NBT, 0:C]                # (64, 32) per-head lane mask
    add_tril = consts[NBT:NBT + BT, :]            # (16, 64) +1.0 on same-batch tril
    bat_mask = consts[NBT + BT:NBT + 2 * BT, :]   # (16, 64) 1.0 iff same batch
    seg = consts[NBT + 2 * BT:, :]                # (64, 64) block-diag same-head ones

    w_in = w_in_ref[...]                          # (C, 8C) bf16 = [Wqkv | Wproj | W1]
    wqkv = w_in[:, 0:3 * C]
    wp = w_in[:, 3 * C:4 * C]
    w1 = w_in[:, 4 * C:8 * C]

    # ---------------- attention branch: x + Proj(Attn(LN1(x))) ----------------
    h = _layernorm(x, g1, be1).astype(jnp.bfloat16)
    qkv = jnp.dot(h, wqkv, preferred_element_type=jnp.float32) + bqkv      # (BT, 3C) f32
    q = qkv[:, 0:C]               # 1/sqrt(HEAD) SDPA scale already folded into Wq/bq
    k = qkv[:, C:2 * C]
    v = qkv[:, 2 * C:3 * C]

    # Stacked K/V: row (h, b, t') = k[b*T+t'] masked to head-h lanes.
    kt = jnp.tile(k, (N_HEAD, 1)) * head_mask                              # (NBT, C)
    vt = jnp.tile(v, (N_HEAD, 1)) * head_mask                              # (NBT, C)

    # Scores for all heads & batches in one MXU matmul:
    #   s[(b,t), (h,b',t')] = q_h(b,t) . k_h(b',t')
    s = jax.lax.dot_general(q, kt, (((1,), (1,)), ((), ())),
                            preferred_element_type=jnp.float32)            # (BT, NBT)
    s = s + add_tril                # additive float tril(ones) mask (bug-for-bug)

    # Per-(batch, head) softmax.  Full-row max is a valid stabilizer; cross-batch
    # terms are zeroed multiplicatively after exp; the "same head" block-diag ones
    # matrix then gives the correct per-head denominator (cross-batch adds 0).
    e = jnp.exp(s - jnp.max(s, axis=-1, keepdims=True)) * bat_mask
    denom = jnp.dot(e, seg, preferred_element_type=jnp.float32)            # (BT, NBT), > 0
    p_attn = e * pl.reciprocal(denom, approx=True)

    # P @ Vt lands heads already concatenated along lanes -> (BT, C).
    att = jnp.dot(p_attn, vt, preferred_element_type=jnp.float32)
    x1 = x + jnp.dot(att.astype(jnp.bfloat16), wp,
                     preferred_element_type=jnp.float32) + bp

    # ---------------- MLP branch: x1 + MLP(LN2(x1)) ----------------
    h2 = _layernorm(x1, g2, be2).astype(jnp.bfloat16)
    m = jnp.dot(h2, w1, preferred_element_type=jnp.float32) + bm1          # (BT, 4C)
    m = 0.5 * m * (1.0 + _erf(m * INV_SQRT2))                              # exact GELU
    m = jnp.dot(m.astype(jnp.bfloat16), w2_ref[...],
                preferred_element_type=jnp.float32) + bm2
    o_ref[...] = x1 + m


def init_params(key):
    ks = jax.random.split(key, 12)
    n = lambda k, shape, s: (s * jax.random.normal(k, shape, jnp.float32))
    return dict(
        wq=n(ks[0], (C, C), 0.02),   bq=n(ks[1], (1, C), 0.01),
        wk=n(ks[2], (C, C), 0.02),   bk=n(ks[3], (1, C), 0.01),
        wv=n(ks[4], (C, C), 0.02),   bv=n(ks[5], (1, C), 0.01),
        wp=n(ks[6], (C, C), 0.02),   bp=n(ks[7], (1, C), 0.01),
        g1=jnp.ones((1, C), jnp.float32),  be1=jnp.zeros((1, C), jnp.float32),
        g2=jnp.ones((1, C), jnp.float32),  be2=jnp.zeros((1, C), jnp.float32),
        w1=n(ks[8], (C, HIDDEN), 0.02),  bm1=n(ks[9], (1, HIDDEN), 0.01),
        w2=n(ks[10], (HIDDEN, C), 0.02), bm2=n(ks[11], (1, C), 0.01),
    )


def make_consts():
    """Host-built kernel constants, packed into one (160, 64) f32 slab."""
    consts = np.zeros((NBT + 2 * BT + NBT, NBT), np.float32)
    # Per-head lane mask for stacked K/V rows: row r belongs to head r // BT.
    r_head = (np.arange(NBT) // BT)[:, None]
    c_head = (np.arange(C) // HEAD)[None, :]
    consts[0:NBT, 0:C] = (r_head == c_head).astype(np.float32)
    # Additive float tril mask (+1 on lower triangle, same batch only) and the
    # multiplicative batch-segment mask.
    rows, cols = np.arange(BT), np.arange(NBT)
    rb, rt = rows // T, rows % T
    cb, ct = (cols % BT) // T, cols % T
    same_b = rb[:, None] == cb[None, :]
    tril = rt[:, None] >= ct[None, :]
    consts[NBT:NBT + BT, :] = (same_b & tril).astype(np.float32)
    consts[NBT + BT:NBT + 2 * BT, :] = same_b.astype(np.float32)
    # Block-diagonal "same head" ones matrix for the segmented softmax denominator.
    hh = np.arange(NBT) // BT
    consts[NBT + 2 * BT:, :] = (hh[:, None] == hh[None, :]).astype(np.float32)
    return jnp.asarray(consts)


def pack_params(p):
    """One-time packing: fold SDPA scale, fuse QKV, bf16 weight slabs, vector slab."""
    scale = float(1.0 / np.sqrt(HEAD))                       # folded into Wq/bq
    wqkv = jnp.concatenate([p['wq'] * scale, p['wk'], p['wv']], axis=1)     # (C, 3C)
    bqkv = jnp.concatenate([p['bq'] * scale, p['bk'], p['bv']], axis=1)     # (1, 3C)
    w_in = jnp.concatenate([wqkv, p['wp'], p['w1']], axis=1).astype(jnp.bfloat16)  # (C, 8C)
    w2 = p['w2'].astype(jnp.bfloat16)                                       # (4C, C)

    vecs = np.zeros((8, 128), np.float32)
    vecs[0, 0:3 * C] = np.asarray(bqkv)[0]
    vecs[1, 0:HIDDEN] = np.asarray(p['bm1'])[0]
    vecs[2, 0:C] = np.asarray(p['g1'])[0]
    vecs[2, C:2 * C] = np.asarray(p['be1'])[0]
    vecs[2, 2 * C:3 * C] = np.asarray(p['g2'])[0]
    vecs[2, 3 * C:4 * C] = np.asarray(p['be2'])[0]
    vecs[3, 0:C] = np.asarray(p['bp'])[0]
    vecs[3, C:2 * C] = np.asarray(p['bm2'])[0]

    return (w_in, w2, jnp.asarray(vecs), make_consts())


def gpt_block(x, packed):
    w_in, w2, vecs, consts = packed
    x2d = x.reshape(BT, C)
    out2d = pl.pallas_call(
        gpt_block_kernel,
        out_shape=jax.ShapeDtypeStruct((BT, C), jnp.float32),
        grid=(1,),                                            # single step: no per-step overhead
        in_specs=[
            pl.BlockSpec((BT, C), lambda i: (0, 0)),          # x: whole (B*T, C) slab
            pl.BlockSpec((C, 8 * C), lambda i: (0, 0)),       # bf16 [Wqkv | Wproj | W1]
            pl.BlockSpec((HIDDEN, C), lambda i: (0, 0)),      # bf16 W2
            pl.BlockSpec((8, 128), lambda i: (0, 0)),         # f32 bias / LN slab
            pl.BlockSpec((NBT + 2 * BT + NBT, NBT), lambda i: (0, 0)),  # f32 constants slab
        ],
        out_specs=pl.BlockSpec((BT, C), lambda i: (0, 0)),
        compiler_params=pltpu.CompilerParams(
            dimension_semantics=("arbitrary",)),
    )(x2d, w_in, w2, vecs, consts)
    return out2d.reshape(B, T, C)


def gpt_block_ref(x, p):
    """Pure-JAX reference on the ORIGINAL (unpacked) f32 params — also checks packing."""
    hp = functools.partial(jnp.dot, precision=jax.lax.Precision.HIGHEST)
    x2 = x.reshape(BT, C)
    h = _layernorm(x2, p['g1'], p['be1'])
    q = hp(h, p['wq']) + p['bq']
    k = hp(h, p['wk']) + p['bk']
    v = hp(h, p['wv']) + p['bv']
    q = q.reshape(B, T, N_HEAD, HEAD).transpose(0, 2, 1, 3)
    k = k.reshape(B, T, N_HEAD, HEAD).transpose(0, 2, 1, 3)
    v = v.reshape(B, T, N_HEAD, HEAD).transpose(0, 2, 1, 3)
    mask = jnp.tril(jnp.ones((T, T), jnp.float32))[None, None]
    s = jnp.einsum('bhqd,bhkd->bhqk', q, k, precision=jax.lax.Precision.HIGHEST)
    s = s / np.sqrt(HEAD) + mask
    pattn = jax.nn.softmax(s, axis=-1)
    o = jnp.einsum('bhqk,bhkd->bhqd', pattn, v, precision=jax.lax.Precision.HIGHEST)
    o = o.transpose(0, 2, 1, 3).reshape(BT, C)
    x1 = x2 + hp(o, p['wp']) + p['bp']
    h2 = _layernorm(x1, p['g2'], p['be2'])
    m = hp(h2, p['w1']) + p['bm1']
    m = 0.5 * m * (1.0 + jax.scipy.special.erf(m / np.sqrt(2.0)))
    m = hp(m, p['w2']) + p['bm2']
    return (x1 + m).reshape(B, T, C)


if __name__ == "__main__":
    key = jax.random.PRNGKey(0)
    kx, kp = jax.random.split(key)
    x = jax.random.normal(kx, (B, T, C), jnp.float32)
    params = init_params(kp)
    packed = pack_params(params)

    out = jax.block_until_ready(gpt_block(x, packed))
    ref = jax.block_until_ready(gpt_block_ref(x, params))

    assert out.shape == (B, T, C)
    assert np.allclose(np.asarray(out), np.asarray(ref), atol=2e-2, rtol=2e-2)
    print("KERNEL_OK")
</pallas_src>

<mosaic_0001>
module attributes {stable_mosaic.version = 11 : i64} {
  func.func @gpt_block_kernel(%arg0: i32, %arg1: memref<16x32xf32, #tpu.memory_space<vmem>>, %arg2: memref<32x256xbf16, #tpu.memory_space<vmem>>, %arg3: memref<128x32xbf16, #tpu.memory_space<vmem>>, %arg4: memref<8x128xf32, #tpu.memory_space<vmem>>, %arg5: memref<160x64xf32, #tpu.memory_space<vmem>>, %arg6: memref<16x32xf32, #tpu.memory_space<vmem>>) attributes {dimension_semantics = [#tpu.dimension_semantics<arbitrary>], iteration_bounds = array<i64: 1>, scalar_prefetch = 0 : i64, scratch_operands = 0 : i64, tpu.core_type = #tpu.core_type<tc>, window_params = [{pipeline_mode = #tpu.pipeline_mode<synchronous>, transform_indices = @transform_0, window_bounds = array<i64: 16, 32>}, {pipeline_mode = #tpu.pipeline_mode<synchronous>, transform_indices = @transform_1, window_bounds = array<i64: 32, 256>}, {pipeline_mode = #tpu.pipeline_mode<synchronous>, transform_indices = @transform_2, window_bounds = array<i64: 128, 32>}, {pipeline_mode = #tpu.pipeline_mode<synchronous>, transform_indices = @transform_3, window_bounds = array<i64: 8, 128>}, {pipeline_mode = #tpu.pipeline_mode<synchronous>, transform_indices = @transform_4, window_bounds = array<i64: 160, 64>}, {pipeline_mode = #tpu.pipeline_mode<synchronous>, transform_indices = @transform_5, window_bounds = array<i64: 16, 32>}]} {
    %c0 = arith.constant 0 : index
    %c0_0 = arith.constant 0 : index
    %0 = vector.load %arg1[%c0, %c0_0] : memref<16x32xf32, #tpu.memory_space<vmem>>, vector<16x32xf32>
    %c0_1 = arith.constant 0 : index
    %c0_2 = arith.constant 0 : index
    %1 = vector.load %arg4[%c0_1, %c0_2] : memref<8x128xf32, #tpu.memory_space<vmem>>, vector<8x128xf32>
    %2 = vector.extract_strided_slice %1 {offsets = [0, 0], sizes = [1, 96], strides = [1, 1]} : vector<8x128xf32> to vector<1x96xf32>
    %3 = vector.extract_strided_slice %1 {offsets = [1, 0], sizes = [1, 128], strides = [1, 1]} : vector<8x128xf32> to vector<1x128xf32>
    %4 = vector.extract_strided_slice %1 {offsets = [2, 0], sizes = [1, 32], strides = [1, 1]} : vector<8x128xf32> to vector<1x32xf32>
    %5 = vector.extract_strided_slice %1 {offsets = [2, 32], sizes = [1, 32], strides = [1, 1]} : vector<8x128xf32> to vector<1x32xf32>
    %6 = vector.extract_strided_slice %1 {offsets = [2, 64], sizes = [1, 32], strides = [1, 1]} : vector<8x128xf32> to vector<1x32xf32>
    %7 = vector.extract_strided_slice %1 {offsets = [2, 96], sizes = [1, 32], strides = [1, 1]} : vector<8x128xf32> to vector<1x32xf32>
    %8 = vector.extract_strided_slice %1 {offsets = [3, 0], sizes = [1, 32], strides = [1, 1]} : vector<8x128xf32> to vector<1x32xf32>
    %9 = vector.extract_strided_slice %1 {offsets = [3, 32], sizes = [1, 32], strides = [1, 1]} : vector<8x128xf32> to vector<1x32xf32>
    %c0_3 = arith.constant 0 : index
    %c0_4 = arith.constant 0 : index
    %10 = vector.load %arg5[%c0_3, %c0_4] : memref<160x64xf32, #tpu.memory_space<vmem>>, vector<160x64xf32>
    %11 = vector.extract_strided_slice %10 {offsets = [0, 0], sizes = [64, 32], strides = [1, 1]} : vector<160x64xf32> to vector<64x32xf32>
    %12 = vector.extract_strided_slice %10 {offsets = [64, 0], sizes = [16, 64], strides = [1, 1]} : vector<160x64xf32> to vector<16x64xf32>
    %13 = vector.extract_strided_slice %10 {offsets = [80, 0], sizes = [16, 64], strides = [1, 1]} : vector<160x64xf32> to vector<16x64xf32>
    %14 = vector.extract_strided_slice %10 {offsets = [96, 0], sizes = [64, 64], strides = [1, 1]} : vector<160x64xf32> to vector<64x64xf32>
    %c0_5 = arith.constant 0 : index
    %c0_6 = arith.constant 0 : index
    %15 = vector.load %arg2[%c0_5, %c0_6] : memref<32x256xbf16, #tpu.memory_space<vmem>>, vector<32x256xbf16>
    %16 = vector.extract_strided_slice %15 {offsets = [0, 0], sizes = [32, 96], strides = [1, 1]} : vector<32x256xbf16> to vector<32x96xbf16>
    %17 = vector.extract_strided_slice %15 {offsets = [0, 96], sizes = [32, 32], strides = [1, 1]} : vector<32x256xbf16> to vector<32x32xbf16>
    %18 = vector.extract_strided_slice %15 {offsets = [0, 128], sizes = [32, 128], strides = [1, 1]} : vector<32x256xbf16> to vector<32x128xbf16>
    %cst = arith.constant dense<0.000000e+00> : vector<16xf32>
    %19 = vector.multi_reduction <add>, %0, %cst [1] : vector<16x32xf32> to vector<16xf32>
    %20 = vector.shape_cast %19 : vector<16xf32> to vector<16x1xf32>
    %cst_7 = arith.constant 3.200000e+01 : f32
    %21 = vector.broadcast %cst_7 : f32 to vector<16x1xf32>
    %22 = arith.divf %20, %21 : vector<16x1xf32>
    %23 = vector.broadcast %22 : vector<16x1xf32> to vector<16x32xf32>
    %24 = arith.subf %0, %23 : vector<16x32xf32>
    %25 = arith.mulf %24, %24 : vector<16x32xf32>
    %cst_8 = arith.constant dense<0.000000e+00> : vector<16xf32>
    %26 = vector.multi_reduction <add>, %25, %cst_8 [1] : vector<16x32xf32> to vector<16xf32>
    %27 = vector.shape_cast %26 : vector<16xf32> to vector<16x1xf32>
    %cst_9 = arith.constant 3.200000e+01 : f32
    %28 = vector.broadcast %cst_9 : f32 to vector<16x1xf32>
    %29 = arith.divf %27, %28 : vector<16x1xf32>
    %30 = vector.broadcast %22 : vector<16x1xf32> to vector<16x32xf32>
    %31 = arith.subf %0, %30 : vector<16x32xf32>
    %cst_10 = arith.constant 9.99999974E-6 : f32
    %32 = vector.broadcast %cst_10 : f32 to vector<16x1xf32>
    %33 = arith.addf %29, %32 : vector<16x1xf32>
    %34 = math.rsqrt %33 : vector<16x1xf32>
    %35 = vector.broadcast %34 : vector<16x1xf32> to vector<16x32xf32>
    %36 = arith.mulf %31, %35 : vector<16x32xf32>
    %37 = vector.broadcast %4 : vector<1x32xf32> to vector<16x32xf32>
    %38 = arith.mulf %36, %37 : vector<16x32xf32>
    %39 = vector.broadcast %5 : vector<1x32xf32> to vector<16x32xf32>
    %40 = arith.addf %38, %39 : vector<16x32xf32>
    %41 = arith.truncf %40 : vector<16x32xf32> to vector<16x32xbf16>
    %cst_11 = arith.constant dense<0.000000e+00> : vector<16x96xf32>
    %42 = tpu.matmul %41, %16, %cst_11 {dimension_numbers = #tpu.dot_dimension_numbers<[1], [0], [0], [1], [0, 0, 1, 1], [], []>} : vector<16x32xbf16>, vector<32x96xbf16>, vector<16x96xf32> -> vector<16x96xf32>
    %43 = vector.broadcast %2 : vector<1x96xf32> to vector<16x96xf32>
    %44 = arith.addf %42, %43 : vector<16x96xf32>
    %45 = vector.extract_strided_slice %44 {offsets = [0, 0], sizes = [16, 32], strides = [1, 1]} : vector<16x96xf32> to vector<16x32xf32>
    %46 = vector.extract_strided_slice %44 {offsets = [0, 32], sizes = [16, 32], strides = [1, 1]} : vector<16x96xf32> to vector<16x32xf32>
    %47 = vector.extract_strided_slice %44 {offsets = [0, 64], sizes = [16, 32], strides = [1, 1]} : vector<16x96xf32> to vector<16x32xf32>
    %48 = tpu.concatenate %46, %46, %46, %46 in 0 : vector<16x32xf32>, vector<16x32xf32>, vector<16x32xf32>, vector<16x32xf32> -> vector<64x32xf32>
    %49 = arith.mulf %48, %11 : vector<64x32xf32>
    %50 = tpu.concatenate %47, %47, %47, %47 in 0 : vector<16x32xf32>, vector<16x32xf32>, vector<16x32xf32>, vector<16x32xf32> -> vector<64x32xf32>
    %51 = arith.mulf %50, %11 : vector<64x32xf32>
    %cst_12 = arith.constant dense<0.000000e+00> : vector<16x64xf32>
    %52 = tpu.matmul %45, %49, %cst_12 {dimension_numbers = #tpu.dot_dimension_numbers<[1], [1], [0], [0], [0, 0, 1, 0], [], []>} : vector<16x32xf32>, vector<64x32xf32>, vector<16x64xf32> -> vector<16x64xf32>
    %53 = arith.addf %52, %12 : vector<16x64xf32>
    %cst_13 = arith.constant dense<0xFF800000> : vector<16xf32>
    %54 = vector.multi_reduction <maximumf>, %53, %cst_13 [1] : vector<16x64xf32> to vector<16xf32>
    %55 = vector.shape_cast %54 : vector<16xf32> to vector<16x1xf32>
    %56 = vector.broadcast %55 : vector<16x1xf32> to vector<16x64xf32>
    %57 = arith.subf %53, %56 : vector<16x64xf32>
    %58 = math.exp %57 : vector<16x64xf32>
    %59 = arith.mulf %58, %13 : vector<16x64xf32>
    %cst_14 = arith.constant dense<0.000000e+00> : vector<16x64xf32>
    %60 = tpu.matmul %59, %14, %cst_14 {dimension_numbers = #tpu.dot_dimension_numbers<[1], [0], [0], [1], [0, 0, 1, 1], [], []>} : vector<16x64xf32>, vector<64x64xf32>, vector<16x64xf32> -> vector<16x64xf32>
    %61 = tpu.reciprocal %60 {approx = true} : vector<16x64xf32> -> vector<16x64xf32>
    %62 = arith.mulf %59, %61 : vector<16x64xf32>
    %cst_15 = arith.constant dense<0.000000e+00> : vector<16x32xf32>
    %63 = tpu.matmul %62, %51, %cst_15 {dimension_numbers = #tpu.dot_dimension_numbers<[1], [0], [0], [1], [0, 0, 1, 1], [], []>} : vector<16x64xf32>, vector<64x32xf32>, vector<16x32xf32> -> vector<16x32xf32>
    %64 = arith.truncf %63 : vector<16x32xf32> to vector<16x32xbf16>
    %cst_16 = arith.constant dense<0.000000e+00> : vector<16x32xf32>
    %65 = tpu.matmul %64, %17, %cst_16 {dimension_numbers = #tpu.dot_dimension_numbers<[1], [0], [0], [1], [0, 0, 1, 1], [], []>} : vector<16x32xbf16>, vector<32x32xbf16>, vector<16x32xf32> -> vector<16x32xf32>
    %66 = arith.addf %0, %65 : vector<16x32xf32>
    %67 = vector.broadcast %8 : vector<1x32xf32> to vector<16x32xf32>
    %68 = arith.addf %66, %67 : vector<16x32xf32>
    %cst_17 = arith.constant dense<0.000000e+00> : vector<16xf32>
    %69 = vector.multi_reduction <add>, %68, %cst_17 [1] : vector<16x32xf32> to vector<16xf32>
    %70 = vector.shape_cast %69 : vector<16xf32> to vector<16x1xf32>
    %cst_18 = arith.constant 3.200000e+01 : f32
    %71 = vector.broadcast %cst_18 : f32 to vector<16x1xf32>
    %72 = arith.divf %70, %71 : vector<16x1xf32>
    %73 = vector.broadcast %72 : vector<16x1xf32> to vector<16x32xf32>
    %74 = arith.subf %68, %73 : vector<16x32xf32>
    %75 = arith.mulf %74, %74 : vector<16x32xf32>
    %cst_19 = arith.constant dense<0.000000e+00> : vector<16xf32>
    %76 = vector.multi_reduction <add>, %75, %cst_19 [1] : vector<16x32xf32> to vector<16xf32>
    %77 = vector.shape_cast %76 : vector<16xf32> to vector<16x1xf32>
    %cst_20 = arith.constant 3.200000e+01 : f32
    %78 = vector.broadcast %cst_20 : f32 to vector<16x1xf32>
    %79 = arith.divf %77, %78 : vector<16x1xf32>
    %80 = vector.broadcast %72 : vector<16x1xf32> to vector<16x32xf32>
    %81 = arith.subf %68, %80 : vector<16x32xf32>
    %cst_21 = arith.constant 9.99999974E-6 : f32
    %82 = vector.broadcast %cst_21 : f32 to vector<16x1xf32>
    %83 = arith.addf %79, %82 : vector<16x1xf32>
    %84 = math.rsqrt %83 : vector<16x1xf32>
    %85 = vector.broadcast %84 : vector<16x1xf32> to vector<16x32xf32>
    %86 = arith.mulf %81, %85 : vector<16x32xf32>
    %87 = vector.broadcast %6 : vector<1x32xf32> to vector<16x32xf32>
    %88 = arith.mulf %86, %87 : vector<16x32xf32>
    %89 = vector.broadcast %7 : vector<1x32xf32> to vector<16x32xf32>
    %90 = arith.addf %88, %89 : vector<16x32xf32>
    %91 = arith.truncf %90 : vector<16x32xf32> to vector<16x32xbf16>
    %cst_22 = arith.constant dense<0.000000e+00> : vector<16x128xf32>
    %92 = tpu.matmul %91, %18, %cst_22 {dimension_numbers = #tpu.dot_dimension_numbers<[1], [0], [0], [1], [0, 0, 1, 1], [], []>} : vector<16x32xbf16>, vector<32x128xbf16>, vector<16x128xf32> -> vector<16x128xf32>
    %93 = vector.broadcast %3 : vector<1x128xf32> to vector<16x128xf32>
    %94 = arith.addf %92, %93 : vector<16x128xf32>
    %cst_23 = arith.constant 5.000000e-01 : f32
    %95 = vector.broadcast %cst_23 : f32 to vector<16x128xf32>
    %96 = arith.mulf %95, %94 : vector<16x128xf32>
    %cst_24 = arith.constant 0.707106769 : f32
    %97 = vector.broadcast %cst_24 : f32 to vector<16x128xf32>
    %98 = arith.mulf %94, %97 : vector<16x128xf32>
    %cst_25 = arith.constant 0.000000e+00 : f32
    %99 = vector.broadcast %cst_25 : f32 to vector<16x128xf32>
    %100 = arith.cmpf oge, %98, %99 : vector<16x128xf32>
    %cst_26 = arith.constant 1.000000e+00 : f32
    %cst_27 = arith.constant -1.000000e+00 : f32
    %101 = vector.broadcast %cst_26 : f32 to vector<16x128xf32>
    %102 = vector.broadcast %cst_27 : f32 to vector<16x128xf32>
    %103 = arith.select %100, %101, %102 : vector<16x128xi1>, vector<16x128xf32>
    %104 = math.absf %98 : vector<16x128xf32>
    %cst_28 = arith.constant 0.327591091 : f32
    %105 = vector.broadcast %cst_28 : f32 to vector<16x128xf32>
    %106 = arith.mulf %105, %104 : vector<16x128xf32>
    %cst_29 = arith.constant 1.000000e+00 : f32
    %107 = vector.broadcast %cst_29 : f32 to vector<16x128xf32>
    %108 = arith.addf %107, %106 : vector<16x128xf32>
    %cst_30 = arith.constant 1.000000e+00 : f32
    %109 = vector.broadcast %cst_30 : f32 to vector<16x128xf32>
    %110 = arith.divf %109, %108 : vector<16x128xf32>
    %cst_31 = arith.constant 1.06140542 : f32
    %111 = vector.broadcast %cst_31 : f32 to vector<16x128xf32>
    %112 = arith.mulf %111, %110 : vector<16x128xf32>
    %cst_32 = arith.constant -1.45315206 : f32
    %113 = vector.broadcast %cst_32 : f32 to vector<16x128xf32>
    %114 = arith.addf %112, %113 : vector<16x128xf32>
    %115 = arith.mulf %114, %110 : vector<16x128xf32>
    %cst_33 = arith.constant 1.42141378 : f32
    %116 = vector.broadcast %cst_33 : f32 to vector<16x128xf32>
    %117 = arith.addf %115, %116 : vector<16x128xf32>
    %118 = arith.mulf %117, %110 : vector<16x128xf32>
    %cst_34 = arith.constant -0.284496725 : f32
    %119 = vector.broadcast %cst_34 : f32 to vector<16x128xf32>
    %120 = arith.addf %118, %119 : vector<16x128xf32>
    %121 = arith.mulf %120, %110 : vector<16x128xf32>
    %cst_35 = arith.constant 0.254829586 : f32
    %122 = vector.broadcast %cst_35 : f32 to vector<16x128xf32>
    %123 = arith.addf %121, %122 : vector<16x128xf32>
    %124 = arith.mulf %123, %110 : vector<16x128xf32>
    %cst_36 = arith.constant 0.000000e+00 : f32
    %125 = vector.broadcast %cst_36 : f32 to vector<16x128xf32>
    %126 = arith.subf %125, %104 : vector<16x128xf32>
    %127 = arith.mulf %126, %104 : vector<16x128xf32>
    %128 = math.exp %127 : vector<16x128xf32>
    %129 = arith.mulf %124, %128 : vector<16x128xf32>
    %cst_37 = arith.constant 1.000000e+00 : f32
    %130 = vector.broadcast %cst_37 : f32 to vector<16x128xf32>
    %131 = arith.subf %130, %129 : vector<16x128xf32>
    %132 = arith.mulf %103, %131 : vector<16x128xf32>
    %cst_38 = arith.constant 1.000000e+00 : f32
    %133 = vector.broadcast %cst_38 : f32 to vector<16x128xf32>
    %134 = arith.addf %133, %132 : vector<16x128xf32>
    %135 = arith.mulf %96, %134 : vector<16x128xf32>
    %136 = arith.truncf %135 : vector<16x128xf32> to vector<16x128xbf16>
    %c0_39 = arith.constant 0 : index
    %c0_40 = arith.constant 0 : index
    %137 = vector.load %arg3[%c0_39, %c0_40] : memref<128x32xbf16, #tpu.memory_space<vmem>>, vector<128x32xbf16>
    %cst_41 = arith.constant dense<0.000000e+00> : vector<16x32xf32>
    %138 = tpu.matmul %136, %137, %cst_41 {dimension_numbers = #tpu.dot_dimension_numbers<[1], [0], [0], [1], [0, 0, 1, 1], [], []>} : vector<16x128xbf16>, vector<128x32xbf16>, vector<16x32xf32> -> vector<16x32xf32>
    %139 = vector.broadcast %9 : vector<1x32xf32> to vector<16x32xf32>
    %140 = arith.addf %138, %139 : vector<16x32xf32>
    %141 = arith.addf %68, %140 : vector<16x32xf32>
    %c0_42 = arith.constant 0 : index
    %c0_43 = arith.constant 0 : index
    %142 = vector.load %arg6[%c0_42, %c0_43] : memref<16x32xf32, #tpu.memory_space<vmem>>, vector<16x32xf32>
    tpu.vector_store %arg6[%c0_42, %c0_43], %141 {strides = array<i32>} : memref<16x32xf32, #tpu.memory_space<vmem>>, vector<16x32xf32>,
    return
  }
  func.func @transform_0(%arg0: i32) -> (i32, i32) {
    %c0_i32 = arith.constant 0 : i32
    %c0_i32_0 = arith.constant 0 : i32
    %c0_i32_1 = arith.constant 0 : i32
    return %c0_i32, %c0_i32_0 : i32, i32
  }
  func.func @transform_1(%arg0: i32) -> (i32, i32) {
    %c0_i32 = arith.constant 0 : i32
    %c0_i32_0 = arith.constant 0 : i32
    %c0_i32_1 = arith.constant 0 : i32
    return %c0_i32, %c0_i32_0 : i32, i32
  }
  func.func @transform_2(%arg0: i32) -> (i32, i32) {
    %c0_i32 = arith.constant 0 : i32
    %c0_i32_0 = arith.constant 0 : i32
    %c0_i32_1 = arith.constant 0 : i32
    return %c0_i32, %c0_i32_0 : i32, i32
  }
  func.func @transform_3(%arg0: i32) -> (i32, i32) {
    %c0_i32 = arith.constant 0 : i32
    %c0_i32_0 = arith.constant 0 : i32
    %c0_i32_1 = arith.constant 0 : i32
    return %c0_i32, %c0_i32_0 : i32, i32
  }
  func.func @transform_4(%arg0: i32) -> (i32, i32) {
    %c0_i32 = arith.constant 0 : i32
    %c0_i32_0 = arith.constant 0 : i32
    %c0_i32_1 = arith.constant 0 : i32
    return %c0_i32, %c0_i32_0 : i32, i32
  }
  func.func @transform_5(%arg0: i32) -> (i32, i32) {
    %c0_i32 = arith.constant 0 : i32
    %c0_i32_0 = arith.constant 0 : i32
    %c0_i32_1 = arith.constant 0 : i32
    return %c0_i32, %c0_i32_0 : i32, i32
  }
}

</mosaic_0001>

<bundles_post_ra>
// kernel: tpu_custom_call.1
= control target key start
LH: loop header
LB: loop body
LE: loop exit
PB: predicated region body
PF: predicated region fallthrough
CT: control target
= control target key end

     0   :  { %vm49_vm0 = vcmask 261120   ;;  %s1589_s0 = inlined_call_operand.vmem [shape: f32[16,32], index: 0, kind: input, shape index: {}]   ;;  %s1590_s1 = inlined_call_operand.vmem [shape: bf16[32,256], index: 1, kind: input, shape index: {}]   ;;  %s1591_s2 = inlined_call_operand.vmem [shape: bf16[128,32], index: 2, kind: input, shape index: {}]   ;;  %s1592_s3 = inlined_call_operand.vmem [shape: f32[8,128], index: 3, kind: input, shape index: {}]   ;;  %s1593_s4 = inlined_call_operand.vmem [shape: f32[160,64], index: 4, kind: input, shape index: {}]   ;;  %s1594_s5 = inlined_call_operand.hbm [shape: f32[16,32], index: 5, kind: output, shape index: {}]  }
   0x1   :  { %v1279_v0 = vld [vmem:[%s1589_s0] sm:$0xff]  ;;  %v1284_v1 = vld [vmem:[%s1589_s0 + $0x8] sm:$0xff] }
   0x2   :  { %v50_v2 = vsel %vm49_vm0, %v1279_v0, 0.0  ;;  %v53_v3 = vsel %vm49_vm0, %v1284_v1, 0.0 }
   0x3   :  { %51 = vadd.xlane.f32.xlu0 %v50_v2 }
   0x7   :  { %54 = vadd.xlane.f32.xlu0 %v53_v3 }
   0x8   :  { %10 = vsyncpa [#allocation3], 0  ;;  %v77_v4 = vlaneseq  ;;  %v1295_v6 = vld [vmem:[%s1592_s3] sm:$0xff]  ;;  %s1237_s0 = smov 96   ;;  %v1238_v20 = vmov 0.0   ;;  %vm1239_vm1 = vmmov 0  }
   0x9   :  { %v1310_v19 = vld [vmem:[%s1590_s1] ss:$8 sps:$4 sm:$0xff]   ;;  %969 = vmatprep.subr.bf16.mxu0 %v1238_v20  ;;  %v1318_v21 = vld [vmem:[%s1590_s1 + $0x10] ss:$8 sps:$4 sm:$0xff]   ;;  %973 = vmatprep.mubr.msk.bf16.mxu0 %vm1239_vm1, %v1238_v20  ;;  %s1240_s29 = smov 32   ;;  %vm1404_vm2 = vmpackc.low %vm49_vm0, %vm49_vm0  ;;  %vm343_vm3 = vcmask 523264  }
   0xa   :  { %v1290_v5 = vshrl.u32 %v77_v4, 7  ;;  %970 = vmatpush3.bf16.msra.mxu0 %v1310_v19  ;;  %v1326_v22 = vld [vmem:[%s1593_s4] sm:$0xff]  ;;  %v1333_v23 = vld [vmem:[%s1593_s4 + $0x18] sm:$0xff]  ;;  %v1338_v24 = vld [vmem:[%s1593_s4 + $0x8] sm:$0xff]  ;;  %s1241_s26 = smov 64  }
   0xb   :  { %971 = vmatprep.subr.bf16.mxu0 %v1238_v20  ;;  %v1345_v25 = vld [vmem:[%s1593_s4 + $0x28] sm:$0xff]  ;;  %v1352_v26 = vld [vmem:[%s1593_s4 + $0x10] sm:$0xff]  ;;  %v1359_v27 = vld [vmem:[%s1593_s4 + $0x38] sm:$0xff] }
   0xc   :  { %v79_v7 = vsub.s32 2, %v1290_v5  ;;  %v1366_v28 = vld [vmem:[%s1593_s4 + $0x20] sm:$0xff]  ;;  %v1375_v29 = vld [vmem:[%s1593_s4 + $0x30] sm:$0xff]  ;;  %v92_v49 = vsub.s32 0, %v1290_v5 }
   0xe   :  { %v1299_v8 = vrot.slane %v1295_v6, %v79_v7  ;;  %972 = vmatpush3.bf16.msra.mxu0 %v1318_v21  ;;  %v93_v51 = vrot.slane %v1295_v6, %v92_v49 }
  0x1d   :  { %84 = vrot.lane.b32.xlu0 %v1299_v8, %s1237_s0 }
  0x21   :  { %164 = vrot.lane.b32.xlu0 %v1333_v23, %s1240_s29 }
  0x25   :  { %168 = vrot.lane.b32.xlu0 %v1345_v25, %s1240_s29 }
  0x29   :  { %172 = vrot.lane.b32.xlu0 %v1359_v27, %s1240_s29 }
  0x90   :  { %v52_v9 = vpop.xlane.xlu0 %51 }
  0x91   :  { %v57_v10 = vmul.f32 0.03125, %v52_v9 }
  0x93   :  { %v59_v11 = vsub.f32 %v1279_v0, %v57_v10 }
  0x94   :  { %v55_v12 = vpop.xlane.xlu0 %54 }
  0x95   :  { %v58_v13 = vmul.f32 0.03125, %v55_v12  ;;  %v61_v14 = vmul.f32 %v59_v11, %v59_v11 }
  0x97   :  { %v60_v15 = vsub.f32 %v1284_v1, %v58_v13  ;;  %v63_v16 = vsel %vm49_vm0, %v61_v14, 0.0 }
  0x98   :  { %64 = vadd.xlane.f32.xlu1 %v63_v16  ;;  %v85_v41 = vpop.permute.xlu0 %84 }
  0x99   :  { %v62_v17 = vmul.f32 %v60_v15, %v60_v15 }
  0x9b   :  { %v66_v18 = vsel %vm49_vm0, %v62_v17, 0.0 }
  0x9c   :  { %67 = vadd.xlane.f32.xlu1 %v66_v18  ;;  %v165_v48 = vpop.permute.xlu0 %164 }
  0xa0   :  { %v169_v52 = vpop.permute.xlu0 %168 }
  0xa4   :  { %v173_v60 = vpop.permute.xlu0 %172 }
  0xad   :  { %158 = vrot.lane.b32.xlu1 %v1326_v22, %s1240_s29 }
  0xb1   :  { %160 = vrot.lane.b32.xlu1 %v1338_v24, %s1240_s29 }
  0xb5   :  { %162 = vrot.lane.b32.xlu1 %v1352_v26, %s1240_s29 }
  0xb9   :  { %166 = vrot.lane.b32.xlu1 %v1366_v28, %s1240_s29 }
  0xbd   :  { %170 = vrot.lane.b32.xlu1 %v1375_v29, %s1240_s29 }
 0x125   :  { %v65_v30 = vpop.xlane.xlu1 %64 }
 0x126   :  { %v69_v31 = vmul.f32 0.03125, %v65_v30 }
 0x128   :  { %v71_v32 = vadd.f32 1e-05, %v69_v31 }
 0x129   :  { %v68_v33 = vpop.xlane.xlu1 %67 }
 0x12a   :  { %1189 = vrsqrt.f32 %v71_v32  ;;  %v70_v34 = vmul.f32 0.03125, %v68_v33 }
 0x12c   :  { %v72_v35 = vadd.f32 1e-05, %v70_v34 }
 0x12d   :  { %v159_v46 = vpop.permute.xlu1 %158 }
 0x12e   :  { %1191 = vrsqrt.f32 %v72_v35 }
 0x131   :  { %v161_v47 = vpop.permute.xlu1 %160 }
 0x134   :  { %v1190_v36 = vpop.eup %1189 }
 0x135   :  { %v75_v37 = vmul.f32 %v1190_v36, %v59_v11  ;;  %v163_v50 = vpop.permute.xlu1 %162 }
 0x137   :  { %v81_v40 = vmul.f32 %v1299_v8, %v75_v37 }
 0x138   :  { %v1192_v38 = vpop.eup %1191 }
 0x139   :  { %v76_v39 = vmul.f32 %v1192_v38, %v60_v15  ;;  %v87_v43 = vadd.f32 %v85_v41, %v81_v40  ;;  %v167_v53 = vpop.permute.xlu1 %166 }
 0x13b   :  { %v82_v42 = vmul.f32 %v1299_v8, %v76_v39 }
 0x13d   :  { %v88_v44 = vadd.f32 %v85_v41, %v82_v42  ;;  %v171_v3 = vpop.permute.xlu1 %170 }
 0x13f   :  { %v89_v45 = vpack.c.bf16 %v88_v44, %v87_v43  ;;  %v34_v43 = vld [vmem:[%s1593_s4 + $0x48] sm:$0xff]  ;;  %v33_v44 = vld [vmem:[%s1593_s4 + $0x40] sm:$0xff] }
 0x141   :  { %974 = vmatmul.mubr.msk.bf16.vlgmr.msra.gmra.mrb[0].mxu0 %vm49_vm0, %v89_v45 }
 0x214   :  { %v143_v54 = vpop.f32.mrb[0].mxu0 }
 0x215   :  { %v1384_v55 = vadd.f32 %v143_v54, %v93_v51  ;;  %v975_v56 = vpop.f32.mrb[1].mxu0  ;;  %v39_v54 = vld [vmem:[%s1593_s4 + $0x70] sm:$0xff] }
 0x216   :  { %v146_v57 = vpop.f32.mrb[2].mxu0  ;;  %v40_v56 = vld [vmem:[%s1593_s4 + $0x78] sm:$0xff] }
 0x217   :  { %v1386_v58 = vadd.f32 %v146_v57, %v93_v51  ;;  %v976_v59 = vpop.f32.mrb[3].mxu0  ;;  %993 = vmatprep.mubr.msk.f32.mxu1 %vm49_vm0, %v1384_v55  ;;  %v182_v61 = vmul.f32 %v159_v46, %v1384_v55  ;;  %v184_v63 = vmul.f32 %v163_v50, %v1384_v55  ;;  %v188_v11 = vmul.f32 %v171_v3, %v1384_v55  ;;  %v37_v51 = vld [vmem:[%s1593_s4 + $0x60] sm:$0xff] }
 0x218   :  { %v186_v12 = vmul.f32 %v167_v53, %v1384_v55  ;;  %v1098_v57 = vpack.c.bf16 %v40_v56, %v39_v54  ;;  %v42_v59 = vld [vmem:[%s1593_s4 + $0x88] sm:$0xff] }
 0x219   :  { %v183_v62 = vmul.f32 %v161_v47, %v1386_v58  ;;  %v185_v2 = vmul.f32 %v165_v48, %v1386_v58  ;;  %v189_v4 = vmul.f32 %v173_v60, %v1386_v58  ;;  %v187_v10 = vmul.f32 %v169_v52, %v1386_v58  ;;  %v38_v52 = vld [vmem:[%s1593_s4 + $0x68] sm:$0xff] }
 0x21a   :  { %v1094_v53 = vpack.c.bf16 %v38_v52, %v37_v51 }
 0x21b   :  { %v1135_v7 = vpack.i.bf16 %v183_v62, %v182_v61  ;;  %v1140_v9 = vpack.i.bf16 %v185_v2, %v184_v63  ;;  %v1150_v13 = vpack.i.bf16 %v189_v4, %v188_v11  ;;  %v1145_v14 = vpack.i.bf16 %v187_v10, %v186_v12 }
 0x21c   :  { %1095 = vmatprep.subr.bf16.mxu0 %v1094_v53 }
 0x21d   :  { %1136 = vrot.lane.b32.xlu1 %v1135_v7, %s1237_s0  ;;  %1141 = vrot.lane.b32.xlu0 %v1140_v9, %s1237_s0 }
 0x21e   :  { %1097 = vmatpush3.bf16.msra.mxu0 %v1094_v53 }
 0x21f   :  { %1099 = vmatprep.subr.bf16.mxu0 %v1098_v57 }
 0x221   :  { %1146 = vrot.lane.b32.xlu1 %v1145_v14, %s1237_s0  ;;  %1151 = vrot.lane.b32.xlu0 %v1150_v13, %s1237_s0 }
 0x222   :  { %1101 = vmatpush3.bf16.msra.mxu0 %v1098_v57 }
 0x28f   :  { %v1137_v15 = vpop.permute.xlu1 %1136  ;;  %v1142_v16 = vpop.permute.xlu0 %1141 }
 0x290   :  { %v1139_v17 = vunpack.i.h.bf16 %v1137_v15  ;;  %v1138_v18 = vunpack.i.l.bf16 %v1137_v15  ;;  %v1144_v30 = vunpack.i.h.bf16 %v1142_v16  ;;  %v1143_v31 = vunpack.i.l.bf16 %v1142_v16 }
 0x292   :  { %v1070_v33 = vpack.c.bf16 %v1139_v17, %v1138_v18  ;;  %v1076_v34 = vpack.c.bf16 %v1144_v30, %v1143_v31  ;;  %v35_v18 = vld [vmem:[%s1593_s4 + $0x50] sm:$0xff]  ;;  %v36_v31 = vld [vmem:[%s1593_s4 + $0x58] sm:$0xff] }
 0x293   :  { %v1147_v35 = vpop.permute.xlu1 %1146  ;;  %v1152_v39 = vpop.permute.xlu0 %1151 }
 0x294   :  { %1072 = vmatprep.subr.msk.bf16.mxu1 %vm1404_vm2, %v1070_v33  ;;  %v1149_v36 = vunpack.i.h.bf16 %v1147_v35  ;;  %v1148_v37 = vunpack.i.l.bf16 %v1147_v35  ;;  %v1154_v40 = vunpack.i.h.bf16 %v1152_v39  ;;  %v1153_v41 = vunpack.i.l.bf16 %v1152_v39 }
 0x295   :  { %1075 = vmatpush3.bf16.xpose.msk.msra.mxu1 %vm1404_vm2, %v1070_v33 }
 0x296   :  { %1078 = vmatprep.subr.msk.bf16.mxu1 %vm1404_vm2, %v1076_v34  ;;  %v1082_v38 = vpack.c.bf16 %v1149_v36, %v1148_v37  ;;  %v1088_v42 = vpack.c.bf16 %v1154_v40, %v1153_v41 }
 0x29d   :  { %1081 = vmatpush3.bf16.xpose.msk.msra.mxu1 %vm1404_vm2, %v1076_v34 }
 0x29e   :  { %1084 = vmatprep.subr.msk.bf16.mxu1 %vm1404_vm2, %v1082_v38 }
 0x2a5   :  { %1087 = vmatpush3.bf16.xpose.msk.msra.mxu1 %vm1404_vm2, %v1082_v38 }
 0x2a6   :  { %1090 = vmatprep.subr.msk.bf16.mxu1 %vm1404_vm2, %v1088_v42 }
 0x2ad   :  { %1093 = vmatpush3.bf16.xpose.msk.msra.mxu1 %vm1404_vm2, %v1088_v42 }
 0x2ae   :  { %1050 = vmatprep.subr.bf16.mxu1 %v1238_v20 }
 0x2b4   :  { %994 = vmatmul.mubr.msk.f32.vlgmr.msra.gmra.mrb[0].mxu1 %vm49_vm0, %v1386_v58 }
 0x2b5   :  { %1066 = vmatprep.mubr.msk.bf16.mxu1 %vm1239_vm1, %v1238_v20 }
 0x387   :  { %v995_v45 = vpop.f32.mrb[0].mxu1 }
 0x388   :  { %v340_v46 = vadd.f32 %v995_v45, %v34_v43  ;;  %v334_v47 = vpop.f32.mrb[1].mxu1 }
 0x389   :  { %v335_v48 = vadd.f32 %v334_v47, %v33_v44 }
 0x38a   :  { %v347_v49 = vsel %vm343_vm3, %v340_v46, -inf }
 0x38b   :  { %348 = vmax.xlane.f32.xlu0 %v347_v49  ;;  %v344_v50 = vsel %vm343_vm3, %v335_v48, -inf }
 0x38c   :  { %345 = vmax.xlane.f32.xlu1 %v344_v50 }
 0x39d   :  { %192 = vrot.lane.b32.xlu1 %v1338_v24, %s1241_s26  ;;  %v41_v24 = vld [vmem:[%s1593_s4 + $0x80] sm:$0xff] }
 0x39e   :  { %v1102_v60 = vpack.c.bf16 %v42_v59, %v41_v24 }
 0x3a0   :  { %1103 = vmatprep.subr.bf16.mxu0 %v1102_v60 }
 0x3a1   :  { %190 = vrot.lane.b32.xlu0 %v1326_v22, %s1241_s26  ;;  %194 = vrot.lane.b32.xlu1 %v1352_v26, %s1241_s26  ;;  %v43_v22 = vld [vmem:[%s1593_s4 + $0x90] sm:$0xff]  ;;  %v44_v26 = vld [vmem:[%s1593_s4 + $0x98] sm:$0xff] }
 0x3a2   :  { %1105 = vmatpush3.bf16.msra.mxu0 %v1102_v60  ;;  %v1106_v61 = vpack.c.bf16 %v44_v26, %v43_v22 }
 0x3a4   :  { %1107 = vmatprep.subr.bf16.mxu0 %v1106_v61 }
 0x3a5   :  { %196 = vrot.lane.b32.xlu0 %v1333_v23, %s1241_s26  ;;  %198 = vrot.lane.b32.xlu1 %v1366_v28, %s1241_s26 }
 0x3a6   :  { %1109 = vmatpush3.bf16.msra.mxu0 %v1106_v61  ;;  %v1177_v61 = vld [vmem:[%s1590_s1 + $0x4] ss:$8 sps:$4 sm:$0xff]  }
 0x3a9   :  { %200 = vrot.lane.b32.xlu0 %v1345_v25, %s1241_s26  ;;  %202 = vrot.lane.b32.xlu1 %v1375_v29, %s1241_s26 }
 0x3ad   :  { %204 = vrot.lane.b32.xlu0 %v1359_v27, %s1241_s26 }
 0x418   :  { %v349_v23 = vpop.xlane.xlu0 %348 }
 0x419   :  { %v351_v28 = vsub.f32 %v340_v46, %v349_v23  ;;  %v346_v62 = vpop.xlane.xlu1 %345 }
 0x41a   :  { %v350_v63 = vsub.f32 %v335_v48, %v346_v62  ;;  %v1180_v62 = vld [vmem:[%s1590_s1 + $0x14] ss:$8 sps:$4 sm:$0xff]  }
 0x41b   :  { %v354_v2 = vmul.f32 1.442695, %v351_v28 }
 0x41c   :  { %v352_v3 = vmul.f32 1.442695, %v350_v63  ;;  %v191_v4 = vpop.permute.xlu0 %190  ;;  %v611_v63 = vsub.s32 3, %v1290_v5 }
 0x41d   :  { %1193 = vpow2.f32 %v354_v2  ;;  %v214_v7 = vmul.f32 %v191_v4, %v1384_v55  ;;  %v193_v9 = vpop.permute.xlu1 %192 }
 0x41e   :  { %1195 = vpow2.f32 %v352_v3  ;;  %v215_v25 = vmul.f32 %v193_v9, %v1386_v58  ;;  %v612_v2 = vrot.slane %v1295_v6, %v611_v63 }
 0x420   :  { %v1155_v29 = vpack.i.bf16 %v215_v25, %v214_v7  ;;  %v197_v10 = vpop.permute.xlu0 %196 }
 0x421   :  { %v217_v11 = vmul.f32 %v197_v10, %v1386_v58  ;;  %v195_v12 = vpop.permute.xlu1 %194 }
 0x422   :  { %v216_v27 = vmul.f32 %v195_v12, %v1384_v55  ;;  %1156 = vrot.lane.b32.xlu1 %v1155_v29, %s1241_s26 }
 0x424   :  { %v1160_v13 = vpack.i.bf16 %v217_v11, %v216_v27  ;;  %v201_v14 = vpop.permute.xlu0 %200 }
 0x425   :  { %v219_v15 = vmul.f32 %v201_v14, %v1386_v58  ;;  %v199_v16 = vpop.permute.xlu1 %198 }
 0x426   :  { %v218_v17 = vmul.f32 %v199_v16, %v1384_v55  ;;  %1161 = vrot.lane.b32.xlu0 %v1160_v13, %s1241_s26 }
 0x427   :  { %v1194_v30 = vpop.eup %1193 }
 0x428   :  { %v1196_v32 = vpop.eup %1195  ;;  %v1165_v33 = vpack.i.bf16 %v219_v15, %v218_v17  ;;  %v205_v34 = vpop.permute.xlu0 %204  ;;  %v357_v39 = vmul.f32 %v1194_v30, %v36_v31 }
 0x429   :  { %v221_v35 = vmul.f32 %v205_v34, %v1386_v58  ;;  %v203_v36 = vpop.permute.xlu1 %202  ;;  %v356_v37 = vmul.f32 %v1196_v32, %v35_v18 }
 0x42a   :  { %v220_v38 = vmul.f32 %v203_v36, %v1384_v55  ;;  %1166 = vrot.lane.b32.xlu1 %v1165_v33, %s1241_s26 }
 0x42b   :  { %1012 = vmatprep.mubr.msk.f32.mxu0 %vm343_vm3, %v356_v37 }
 0x42c   :  { %v1170_v40 = vpack.i.bf16 %v221_v35, %v220_v38  ;;  %1013 = vmatmul.mubr.msk.f32.vlgmr.msra.gmra.mrb[4].mxu0 %vm343_vm3, %v357_v39 }
 0x42e   :  { %1171 = vrot.lane.b32.xlu0 %v1170_v40, %s1241_s26  ;;  %557 = vrot.lane.b32.xlu1 %v1310_v19, %s1240_s29 }
 0x432   :  { %559 = vrot.lane.b32.xlu0 %v1318_v21, %s1240_s29 }
 0x494   :  { %v1157_v58 = vpop.permute.xlu1 %1156 }
 0x495   :  { %v1159_v41 = vunpack.i.h.bf16 %v1157_v58  ;;  %v1158_v42 = vunpack.i.l.bf16 %v1157_v58 }
 0x497   :  { %v1110_v55 = vpack.c.bf16 %v1159_v41, %v1158_v42 }
 0x498   :  { %v1162_v43 = vpop.permute.xlu0 %1161 }
 0x499   :  { %v1164_v44 = vunpack.i.h.bf16 %v1162_v43  ;;  %v1163_v45 = vunpack.i.l.bf16 %v1162_v43  ;;  %1111 = vmatprep.subr.bf16.mxu0 %v1110_v55 }
 0x49a   :  { %1113 = vmatpush3.bf16.msra.mxu0 %v1110_v55 }
 0x49b   :  { %v1114_v46 = vpack.c.bf16 %v1164_v44, %v1163_v45 }
 0x49c   :  { %v1167_v47 = vpop.permute.xlu1 %1166 }
 0x49d   :  { %v1169_v48 = vunpack.i.h.bf16 %v1167_v47  ;;  %v1168_v49 = vunpack.i.l.bf16 %v1167_v47  ;;  %1115 = vmatprep.subr.bf16.mxu0 %v1114_v46  ;;  %v1182_v47 = vld [vmem:[%s1591_s2 + $0x8] sm:$0xff]  }
 0x49e   :  { %1117 = vmatpush3.bf16.msra.mxu0 %v1114_v46 }
 0x49f   :  { %v1118_v50 = vpack.c.bf16 %v1169_v48, %v1168_v49  ;;  %v1183_v48 = vld [vmem:[%s1591_s2 + $0x10] sm:$0xff]   ;;  %v1184_v49 = vld [vmem:[%s1591_s2 + $0x18] sm:$0xff]  }
 0x4a0   :  { %v1172_v19 = vpop.permute.xlu0 %1171  ;;  %v558_v60 = vpop.permute.xlu1 %557 }
 0x4a1   :  { %v1174_v51 = vunpack.i.h.bf16 %v1172_v19  ;;  %v1173_v52 = vunpack.i.l.bf16 %v1172_v19  ;;  %1119 = vmatprep.subr.bf16.mxu0 %v1118_v50  ;;  %v1186_v19 = vld [vmem:[%s1591_s2 + $0x28] sm:$0xff]  }
 0x4a2   :  { %1121 = vmatpush3.bf16.msra.mxu0 %v1118_v50  ;;  %v1185_v50 = vld [vmem:[%s1591_s2 + $0x20] sm:$0xff]  }
 0x4a3   :  { %v1122_v21 = vpack.c.bf16 %v1174_v51, %v1173_v52  ;;  %v1187_v51 = vld [vmem:[%s1591_s2 + $0x30] sm:$0xff]   ;;  %v1188_v52 = vld [vmem:[%s1591_s2 + $0x38] sm:$0xff]  }
 0x4a4   :  { %v560_v22 = vpop.permute.xlu0 %559 }
 0x4a5   :  { %1123 = vmatprep.subr.bf16.mxu0 %v1122_v21 }
 0x4a6   :  { %1125 = vmatpush3.bf16.msra.mxu0 %v1122_v21  ;;  %v654_v21 = vsub.s32 1, %v1290_v5 }
 0x4a7   :  { %1034 = vmatprep.subr.bf16.mxu0 %v1238_v20 }
 0x4ff   :  { %v1014_v53 = vpop.f32.mrb[4].mxu0 }
 0x500   :  { %1197 = vrcp.f32 %v1014_v53  ;;  %v430_v54 = vpop.f32.mrb[5].mxu0  ;;  %v655_v53 = vrot.slane %v1295_v6, %v654_v21 }
 0x501   :  { %1199 = vrcp.f32 %v430_v54 }
 0x50a   :  { %v1198_v56 = vpop.eup %1197 }
 0x50b   :  { %v1200_v57 = vpop.eup %1199  ;;  %v442_v59 = vmul.f32 %v1198_v56, %v357_v39 }
 0x50c   :  { %v441_v24 = vmul.f32 %v1200_v57, %v356_v37 }
 0x50e   :  { %1031 = vmatprep.mubr.msk.f32.mxu0 %vm343_vm3, %v441_v24 }
 0x50f   :  { %1032 = vmatmul.mubr.msk.f32.vlgmr.msra.gmra.mrb[6].mxu0 %vm343_vm3, %v442_v59 }
 0x510   :  { %1035 = vmatpush3.bf16.msra.mxu0 %v558_v60  ;;  %1038 = vmatprep.mubr.msk.bf16.mxu0 %vm1239_vm1, %v1238_v20 }
 0x511   :  { %1036 = vmatprep.subr.bf16.mxu0 %v1238_v20 }
 0x514   :  { %1037 = vmatpush3.bf16.msra.mxu0 %v560_v22 }
 0x515   :  { %1042 = vmatprep.subr.bf16.mxu0 %v1238_v20 }
 0x5e2   :  { %v1033_v26 = vpop.f32.mrb[6].mxu0 }
 0x5e3   :  { %v547_v23 = vpop.f32.mrb[7].mxu0 }
 0x5e4   :  { %v556_v28 = vpack.c.bf16 %v1033_v26, %v547_v23 }
 0x5e6   :  { %1039 = vmatmul.mubr.msk.bf16.vlgmr.msra.gmra.mrb[8].mxu0 %vm49_vm0, %v556_v28 }
 0x5e7   :  { %1043 = vmatpush3.bf16.msra.mxu0 %v1177_v61  ;;  %1046 = vmatprep.mubr.msk.bf16.mxu0 %vm1239_vm1, %v1238_v20 }
 0x5e8   :  { %1044 = vmatprep.subr.bf16.mxu0 %v1238_v20 }
 0x5eb   :  { %1045 = vmatpush3.bf16.msra.mxu0 %v1180_v62 }
 0x6b9   :  { %v600_v3 = vpop.f32.mrb[8].mxu0 }
 0x6ba   :  { %v607_v4 = vadd.f32 %v600_v3, %v1279_v0  ;;  %v1040_v7 = vpop.f32.mrb[9].mxu0 }
 0x6bb   :  { %v603_v9 = vpop.f32.mrb[10].mxu0 }
 0x6bc   :  { %v1521_v25 = vadd.f32 %v612_v2, %v607_v4  ;;  %v608_v29 = vadd.f32 %v603_v9, %v1284_v1  ;;  %v1041_v10 = vpop.f32.mrb[11].mxu0 }
 0x6be   :  { %v1524_v11 = vadd.f32 %v612_v2, %v608_v29  ;;  %v615_v12 = vsel %vm49_vm0, %v1521_v25, 0.0 }
 0x6bf   :  { %616 = vadd.xlane.f32.xlu1 %v615_v12 }
 0x6c0   :  { %v618_v27 = vsel %vm49_vm0, %v1524_v11, 0.0 }
 0x6c1   :  { %619 = vadd.xlane.f32.xlu0 %v618_v27 }
 0x6d0   :  { %641 = vrot.lane.b32.xlu1 %v1299_v8, %s1241_s26 }
 0x6d4   :  { %828 = vrot.lane.b32.xlu1 %v612_v2, %s1237_s0 }
 0x74c   :  { %v617_v0 = vpop.xlane.xlu1 %616 }
 0x74d   :  { %v621_v13 = vmul.f32 0.03125, %v617_v0 }
 0x74e   :  { %v620_v14 = vpop.xlane.xlu0 %619 }
 0x74f   :  { %v623_v1 = vsub.f32 %v1521_v25, %v621_v13  ;;  %v622_v15 = vmul.f32 0.03125, %v620_v14 }
 0x750   :  { %v642_v40 = vpop.permute.xlu1 %641 }
 0x751   :  { %v624_v16 = vsub.f32 %v1524_v11, %v622_v15  ;;  %v625_v17 = vmul.f32 %v623_v1, %v623_v1 }
 0x753   :  { %v627_v18 = vsel %vm49_vm0, %v625_v17, 0.0  ;;  %v626_v30 = vmul.f32 %v624_v16, %v624_v16 }
 0x754   :  { %628 = vadd.xlane.f32.xlu0 %v627_v18 }
 0x755   :  { %v630_v31 = vsel %vm49_vm0, %v626_v30, 0.0 }
 0x758   :  { %631 = vadd.xlane.f32.xlu0 %v630_v31 }
 0x76e   :  { %646 = vrot.lane.b32.xlu0 %v1299_v8, %s1240_s29  ;;  %v1181_v8 = vld [vmem:[%s1591_s2] sm:$0xff]   ;;  %s1243_s2 = smov [#allocation2]  }
 0x76f   :  { %1051 = vmatpush3.bf16.msra.mxu1 %v1181_v8  ;;  %s881_s10 = sshll.u32 %s1243_s2, 4  ;;  %s882_s10 = int_to_ptr.vmem [resolvable:$true] %s881_s10 }
 0x770   :  { %1052 = vmatprep.subr.bf16.mxu1 %v1238_v20  ;;  %s1213_s11 = scalar_lea.vmem %s882_s10, 256  ;;  %p1218_p1 = scmp.lt.s32.totalorder %s882_s10, %s882_s10 }
 0x771   :  { %p1214_p0 = scmp.ne.s32.totalorder %s882_s10, %s1213_s11  ;;  %p1219_p2 = scmp.lt.s32.totalorder %s1213_s11, %s1213_s11 }
 0x773   :  { %1053 = vmatpush3.bf16.msra.mxu1 %v1182_v47  ;;  %p1220_p3 = por %p1219_p2, %p1218_p1 }
 0x774   :  { %1054 = vmatprep.subr.bf16.mxu1 %v1238_v20 }
 0x775   :  { %p1221_p4 = pnand %p1220_p3, %p1214_p0 }
 0x777   :  { %1055 = vmatpush3.bf16.msra.mxu1 %v1183_v48 }
 0x778   :  { %1056 = vmatprep.subr.bf16.mxu1 %v1238_v20 }
 0x77b   :  { %1057 = vmatpush3.bf16.msra.mxu1 %v1184_v49 }
 0x77c   :  { %1058 = vmatprep.subr.bf16.mxu1 %v1238_v20 }
 0x77f   :  { %1059 = vmatpush3.bf16.msra.mxu1 %v1185_v50 }
 0x780   :  { %1060 = vmatprep.subr.bf16.mxu1 %v1238_v20 }
 0x783   :  { %1061 = vmatpush3.bf16.msra.mxu1 %v1186_v19 }
 0x784   :  { %1062 = vmatprep.subr.bf16.mxu1 %v1238_v20 }
 0x787   :  { %1063 = vmatpush3.bf16.msra.mxu1 %v1187_v51  ;;  %v829_v51 = vpop.permute.xlu1 %828 }
 0x788   :  { %1064 = vmatprep.subr.bf16.mxu1 %v1238_v20 }
 0x78b   :  { %1065 = vmatpush3.bf16.msra.mxu1 %v1188_v52 }
 0x7e1   :  { %v629_v32 = vpop.xlane.xlu0 %628 }
 0x7e2   :  { %v633_v33 = vmul.f32 0.03125, %v629_v32 }
 0x7e4   :  { %v635_v34 = vadd.f32 1e-05, %v633_v33 }
 0x7e5   :  { %v632_v35 = vpop.xlane.xlu0 %631 }
 0x7e6   :  { %1201 = vrsqrt.f32 %v635_v34  ;;  %v634_v36 = vmul.f32 0.03125, %v632_v35 }
 0x7e8   :  { %v636_v37 = vadd.f32 1e-05, %v634_v36 }
 0x7e9   :  { %v647_v55 = vpop.permute.xlu0 %646 }
 0x7ea   :  { %1203 = vrsqrt.f32 %v636_v37 }
 0x7f0   :  { %v1202_v38 = vpop.eup %1201 }
 0x7f1   :  { %v639_v39 = vmul.f32 %v1202_v38, %v623_v1 }
 0x7f3   :  { %v644_v42 = vmul.f32 %v642_v40, %v639_v39 }
 0x7f4   :  { %v1204_v58 = vpop.eup %1203 }
 0x7f5   :  { %v640_v41 = vmul.f32 %v1204_v58, %v624_v16  ;;  %v649_v44 = vadd.f32 %v647_v55, %v644_v42  ;;  %v1242_v58 = vmov -1.0  }
 0x7f7   :  { %v645_v43 = vmul.f32 %v642_v40, %v640_v41 }
 0x7f9   :  { %v650_v45 = vadd.f32 %v647_v55, %v645_v43 }
 0x7fb   :  { %v651_v46 = vpack.c.bf16 %v650_v45, %v649_v44 }
 0x7fd   :  { %1047 = vmatmul.mubr.msk.bf16.vlgmr.msra.gmra.mrb[12].mxu0 %vm49_vm0, %v651_v46 }
 0x8d0   :  { %v701_v54 = vpop.f32.mrb[12].mxu0 }
 0x8d1   :  { %v702_v56 = vadd.f32 %v701_v54, %v655_v53  ;;  %v1048_v57 = vpop.f32.mrb[13].mxu0 }
 0x8d2   :  { %v704_v24 = vpop.f32.mrb[14].mxu0 }
 0x8d3   :  { %v710_v59 = vmul.f32 0.70710677, %v702_v56  ;;  %v705_v60 = vadd.f32 %v704_v24, %v655_v53  ;;  %v1049_v22 = vpop.f32.mrb[15].mxu0  ;;  %v708_v8 = vmul.f32 0.5, %v702_v56 }
 0x8d5   :  { %v716_v26 = vand.u32 2147483647, %v710_v59  ;;  %v711_v61 = vmul.f32 0.70710677, %v705_v60  ;;  %vm712_vm4 = vcmp.ge.f32.partialorder %v710_v59, 0.0  ;;  %v709_v47 = vmul.f32 0.5, %v705_v60 }
 0x8d6   :  { %v714_v41 = vsel %vm712_vm4, 1.0, %v1242_v58 }
 0x8d7   :  { %v718_v23 = vmul.f32 0.3275911, %v716_v26  ;;  %v717_v20 = vand.u32 2147483647, %v711_v61  ;;  %v744_v2 = vsub.f32 0.0, %v716_v26  ;;  %vm713_vm5 = vcmp.ge.f32.partialorder %v711_v61, 0.0 }
 0x8d8   :  { %v715_v44 = vsel %vm713_vm5, 1.0, %v1242_v58 }
 0x8d9   :  { %v720_v28 = vadd.f32 1.0, %v718_v23  ;;  %v719_v62 = vmul.f32 0.3275911, %v717_v20  ;;  %v745_v5 = vsub.f32 0.0, %v717_v20  ;;  %v746_v6 = vmul.f32 %v744_v2, %v716_v26 }
 0x8db   :  { %1205 = vrcp.f32 %v720_v28  ;;  %v721_v63 = vadd.f32 1.0, %v719_v62  ;;  %v747_v29 = vmul.f32 %v745_v5, %v717_v20  ;;  %v748_v10 = vmul.f32 1.442695, %v746_v6 }
 0x8dd   :  { %1207 = vrcp.f32 %v721_v63  ;;  %v750_v14 = vmul.f32 1.442695, %v747_v29 }
 0x8de   :  { %1209 = vpow2.f32 %v748_v10 }
 0x8df   :  { %1211 = vpow2.f32 %v750_v14 }
 0x8e5   :  { %v1206_v3 = vpop.eup %1205 }
 0x8e6   :  { %v726_v4 = vmul.f32 1.0614054, %v1206_v3 }
 0x8e7   :  { %v1208_v7 = vpop.eup %1207 }
 0x8e8   :  { %v728_v9 = vadd.f32 -1.4531521, %v726_v4  ;;  %v727_v12 = vmul.f32 1.0614054, %v1208_v7  ;;  %v1210_v35 = vpop.eup %1209 }
 0x8e9   :  { %v1212_v39 = vpop.eup %1211 }
 0x8ea   :  { %v730_v27 = vmul.f32 %v1206_v3, %v728_v9  ;;  %v729_v0 = vadd.f32 -1.4531521, %v727_v12 }
 0x8ec   :  { %v732_v13 = vadd.f32 1.4214138, %v730_v27  ;;  %v731_v1 = vmul.f32 %v1208_v7, %v729_v0 }
 0x8ee   :  { %v734_v15 = vmul.f32 %v1206_v3, %v732_v13  ;;  %v733_v16 = vadd.f32 1.4214138, %v731_v1 }
 0x8f0   :  { %v736_v17 = vadd.f32 -0.28449672, %v734_v15  ;;  %v735_v18 = vmul.f32 %v1208_v7, %v733_v16 }
 0x8f2   :  { %v738_v30 = vmul.f32 %v1206_v3, %v736_v17  ;;  %v737_v31 = vadd.f32 -0.28449672, %v735_v18 }
 0x8f4   :  { %v740_v32 = vadd.f32 0.2548296, %v738_v30  ;;  %v739_v33 = vmul.f32 %v1208_v7, %v737_v31 }
 0x8f6   :  { %v742_v34 = vmul.f32 %v1206_v3, %v740_v32  ;;  %v741_v36 = vadd.f32 0.2548296, %v739_v33 }
 0x8f8   :  { %v752_v37 = vmul.f32 %v1210_v35, %v742_v34  ;;  %v743_v38 = vmul.f32 %v1208_v7, %v741_v36 }
 0x8fa   :  { %v754_v40 = vsub.f32 1.0, %v752_v37  ;;  %v753_v42 = vmul.f32 %v1212_v39, %v743_v38 }
 0x8fc   :  { %v756_v55 = vmul.f32 %v754_v40, %v714_v41  ;;  %v755_v43 = vsub.f32 1.0, %v753_v42 }
 0x8fe   :  { %v758_v45 = vadd.f32 1.0, %v756_v55  ;;  %v757_v46 = vmul.f32 %v755_v43, %v715_v44 }
 0x900   :  { %v759_v48 = vadd.f32 1.0, %v757_v46  ;;  %v760_v49 = vmul.f32 %v758_v45, %v708_v8 }
 0x902   :  { %v761_v50 = vmul.f32 %v759_v48, %v709_v47 }
 0x904   :  { %v762_v19 = vpack.c.bf16 %v761_v50, %v760_v49 }
 0x906   :  { %1067 = vmatmul.mubr.bf16.vlgmr.msra.gmra.mrb[4].mxu1 %v762_v19 }
 0x9d9   :  { %v865_v52 = vpop.f32.mrb[4].mxu1 }
 0x9da   :  { %v866_v21 = vadd.f32 %v865_v52, %v829_v51  ;;  %v1068_v53 = vpop.f32.mrb[5].mxu1 }
 0x9db   :  { %v868_v54 = vpop.f32.mrb[6].mxu1 }
 0x9dc   :  { %v872_v57 = vadd.f32 %v866_v21, %v1521_v25  ;;  %v869_v24 = vadd.f32 %v868_v54, %v829_v51  ;;  %v1069_v59 = vpop.f32.mrb[7].mxu1 }
 0x9de   :  { %874 = vst.msk [vmem:[#allocation2] sm:$0xff] %vm49_vm0, %v872_v57  ;;  %v873_v56 = vadd.f32 %v869_v24, %v1524_v11 }
 0x9e0   :  { %875 = vst.msk [vmem:[#allocation2 + $0x8] sm:$0xff] %vm49_vm0, %v873_v56 }
 0x9e1   :  { %1224 = shalt.err (!%p1221_p4)
}
 0x9e2   :  { %s1225_s14 = scalar_lea.hbm %s1594_s5, 256 }
 0x9e3   :  { %p1226_p5 = scmp.ne.s32.totalorder %s1594_s5, %s1225_s14  ;;  %p1229_p6 = scmp.lt.u32.totalorder %s1225_s14, %s1594_s5 }
 0x9e5   :  { %p1231_p7 = pnand %p1229_p6, %p1226_p5 }
 0x9e7   :  { %1234 = shalt.err (!%p1231_p7)
}
 0x9e8   :  { %s1244_s4 = smov 128   ;;  %s1245_s19 = smov 8  }
 0x9e9   :  { %887 = dma.vmem_to_hbm [thread:$0]  %s882_s10, 256, %s1594_s5, [#allocation3], %s1244_s4, %s1244_s4, %s1245_s19  }
 0x9ea   :  { %1235 = dma.done.wait [#allocation3], 256  }
 0x9eb   :  { %1236 = vsyncadd [#allocation3], 4294967040 }
 0x9ec   :  { %891 = vsyncpa [#allocation3], 1 }

</bundles_post_ra>
